<compile_context>
chip_gen: v7x
topology: tpu7x:2x2x1
jax: 0.10.0
libtpu: 0.0.40
codegen_flags: <defaults>
</compile_context>

<pallas_src>
import jax
import jax.numpy as jnp
from jax.experimental import pallas as pl
from jax.experimental.pallas import tpu as pltpu


def _round_up(n, m):
    return ((n + m - 1) // m) * m


def _mlp_kernel(x_ref, w1_ref, b1_ref, w2_ref, b2_ref, o_ref):
    # Cast the raw f32 activations to the MXU dtype in-kernel (free VPU slots under
    # the MXU/DMA) instead of materializing a padded bf16 copy of x in HBM.
    x = x_ref[...].astype(w1_ref.dtype)
    # linear1 on the MXU, f32 accumulation.
    h = jnp.dot(x, w1_ref[...], preferred_element_type=jnp.float32)
    # bias + ReLU in f32 on the VPU (v5e has no bf16 VPU/EUP).
    h = jnp.maximum(h + b1_ref[...], 0.0)
    # linear2: activations back to the MXU dtype, f32 accumulation.
    out = jnp.dot(h.astype(w2_ref.dtype), w2_ref[...],
                  preferred_element_type=jnp.float32)
    o_ref[...] = (out + b2_ref[...]).astype(o_ref.dtype)


def _vmem_capacity_bytes():
    try:
        return int(pltpu.get_tpu_info().vmem_capacity_bytes)
    except Exception:
        return 64 << 20  # conservative fallback: v7x per-TensorCore VMEM


def multimodal_transformer_forward(x, w1, b1, w2, b2, *,
                                   mxu_dtype=jnp.bfloat16,
                                   small_batch_threshold=512,
                                   max_batch_tile=1024,
                                   min_grid_steps=4):
    """x: (B, D_in); w1: (D_in, H); b1: (1, H) or (H,); w2: (H, D_out); b2: (1, D_out) or (D_out,).

    Returns (B, D_out) float32.
    """
    x = jnp.asarray(x, jnp.float32)
    w1 = jnp.asarray(w1, jnp.float32)
    w2 = jnp.asarray(w2, jnp.float32)
    b1 = jnp.asarray(b1, jnp.float32).reshape(1, -1)
    b2 = jnp.asarray(b2, jnp.float32).reshape(1, -1)

    B, D_in = x.shape
    H = w1.shape[1]
    D_out = w2.shape[1]

    # Lane-dense padding for the hidden / output feature axes only (one-time, amortized).
    # TODO(synk): if H ever reaches >=256, round Hp to 256 on v6e/v7x (256x256 MXU) while
    # keeping 128 on v5e (4x128 MXU); at H=64 further padding is pure DMA waste.
    Hp = _round_up(H, 128)
    Np = _round_up(D_out, 128)

    w1p = jnp.pad(w1, ((0, 0), (0, Hp - H))).astype(mxu_dtype)          # (D_in, Hp)
    b1p = jnp.pad(b1, ((0, 0), (0, Hp - H)))                            # (1, Hp) f32
    w2p = jnp.pad(w2, ((0, Hp - H), (0, Np - D_out))).astype(mxu_dtype)  # (Hp, Np)
    b2p = jnp.pad(b2, ((0, 0), (0, Np - D_out)))                        # (1, Np) f32

    mxu_itemsize = jnp.dtype(mxu_dtype).itemsize
    # Advisory cost with the real (unpadded) dims.
    cost = pl.CostEstimate(
        flops=2 * B * (D_in * H + H * D_out),
        transcendentals=0,
        bytes_accessed=(B * D_in * 4
                        + D_in * H * mxu_itemsize + H * 4
                        + H * D_out * mxu_itemsize + D_out * 4
                        + B * D_out * 4),
    )

    if B <= small_batch_threshold:
        # Small batch: no grid, no pipelining machinery — everything resident in VMEM,
        # raw f32 x passed straight through (cast happens in-kernel).
        out = pl.pallas_call(
            _mlp_kernel,
            out_shape=jax.ShapeDtypeStruct((B, Np), jnp.float32),
            in_specs=[pl.BlockSpec(memory_space=pltpu.MemorySpace.VMEM)] * 5,
            out_specs=pl.BlockSpec(memory_space=pltpu.MemorySpace.VMEM),
            cost_estimate=cost,
        )(x, w1p, b1p, w2p, b2p)
        return out[:, :D_out]

    # Large batch: tile over rows; weights/biases stay resident (constant index_map);
    # batch axis is "parallel" so v7x can shard it across its 2 TensorCores.
    Bp = _round_up(B, 8)
    # >= min_grid_steps (>= 2 per TensorCore on v7x) so the software pipeline overlaps;
    # even step count balances the two cores; TB derived from steps so batch padding is
    # bounded by ~8*steps rows instead of up to a full tile.
    n_steps = max(min_grid_steps, pl.cdiv(Bp, max_batch_tile))
    n_steps = _round_up(n_steps, 2)
    TB = _round_up(pl.cdiv(Bp, n_steps), 8)
    Bp = _round_up(Bp, TB)
    xp = jnp.pad(x, ((0, Bp - B), (0, 0)))  # zero rows only; sliced away below

    # VMEM budget: double-buffered x/out tiles + resident (double-buffered) weights.
    weight_bytes = (D_in * Hp + Hp * Np) * mxu_itemsize + (Hp + Np) * 4
    stream_bytes = TB * D_in * 4 + TB * Np * 4
    need = 2 * (weight_bytes + stream_bytes)
    capacity = _vmem_capacity_bytes()
    vmem_limit = min(max(4 * need, 32 << 20), int(0.75 * capacity))
    # TODO(synk): at real transformer widths (weight_bytes > ~capacity/4) drop full-weight
    # residency and add a K-reduction grid axis ("arbitrary") with an f32 VMEM accumulator
    # and pl.when init/finalize.

    out = pl.pallas_call(
        _mlp_kernel,
        out_shape=jax.ShapeDtypeStruct((Bp, Np), jnp.float32),
        grid=(Bp // TB,),
        in_specs=[
            pl.BlockSpec((TB, D_in), lambda i: (i, 0)),   # raw f32 rows, cast in kernel
            pl.BlockSpec((D_in, Hp), lambda i: (0, 0)),   # resident weights
            pl.BlockSpec((1, Hp), lambda i: (0, 0)),
            pl.BlockSpec((Hp, Np), lambda i: (0, 0)),
            pl.BlockSpec((1, Np), lambda i: (0, 0)),
        ],
        out_specs=pl.BlockSpec((TB, Np), lambda i: (i, 0)),
        compiler_params=pltpu.CompilerParams(
            dimension_semantics=("parallel",),
            vmem_limit_bytes=vmem_limit,
        ),
        cost_estimate=cost,
    )(xp, w1p, b1p, w2p, b2p)
    return out[:B, :D_out]


def _reference_forward(x, w1, b1, w2, b2):
    h = jnp.maximum(x @ w1 + b1.reshape(1, -1), 0.0)
    return h @ w2 + b2.reshape(1, -1)


if __name__ == "__main__":
    batch = 8
    input_size = 32
    hidden_size = 64
    output_size = 3

    key = jax.random.PRNGKey(0)
    kx, kw1, kb1, kw2, kb2, kx2 = jax.random.split(key, 6)

    x = jax.random.normal(kx, (batch, input_size), dtype=jnp.float32)

    # PyTorch-Linear-style init (uniform +-1/sqrt(fan_in)); weights pre-transposed to (in, out).
    bound1 = 1.0 / (input_size ** 0.5)
    w1 = jax.random.uniform(kw1, (input_size, hidden_size), jnp.float32, -bound1, bound1)
    b1 = jax.random.uniform(kb1, (1, hidden_size), jnp.float32, -bound1, bound1)
    bound2 = 1.0 / (hidden_size ** 0.5)
    w2 = jax.random.uniform(kw2, (hidden_size, output_size), jnp.float32, -bound2, bound2)
    b2 = jax.random.uniform(kb2, (1, output_size), jnp.float32, -bound2, bound2)

    # Jit the whole wrapper so the pad / final slice fuse with producers/consumers
    # instead of materializing the padded slab twice.
    fwd = jax.jit(multimodal_transformer_forward)

    # Small-batch (grid-less) path.
    out = jax.block_until_ready(fwd(x, w1, b1, w2, b2))
    ref = _reference_forward(x, w1, b1, w2, b2)
    assert out.shape == (batch, output_size), out.shape
    assert jnp.allclose(out, ref, atol=2e-2, rtol=2e-2), "mismatch vs reference (small batch)"

    # Larger batch to exercise the batch-tiled grid path (non-multiple of the tile on purpose).
    big_batch = 1000
    x_big = jax.random.normal(kx2, (big_batch, input_size), dtype=jnp.float32)
    out_big = jax.block_until_ready(fwd(x_big, w1, b1, w2, b2))
    ref_big = _reference_forward(x_big, w1, b1, w2, b2)
    assert out_big.shape == (big_batch, output_size), out_big.shape
    assert jnp.allclose(out_big, ref_big, atol=2e-2, rtol=2e-2), "mismatch vs reference (big batch)"

    print("KERNEL_OK")
</pallas_src>

<mosaic_0001>
module attributes {stable_mosaic.version = 11 : i64} {
  func.func @_mlp_kernel(%arg0: memref<8x32xf32, #tpu.memory_space<vmem>>, %arg1: memref<32x128xbf16, #tpu.memory_space<vmem>>, %arg2: memref<1x128xf32, #tpu.memory_space<vmem>>, %arg3: memref<128x128xbf16, #tpu.memory_space<vmem>>, %arg4: memref<1x128xf32, #tpu.memory_space<vmem>>, %arg5: memref<8x128xf32, #tpu.memory_space<vmem>>) attributes {dimension_semantics = [], scalar_prefetch = 0 : i64, scratch_operands = 0 : i64, tpu.core_type = #tpu.core_type<tc>} {
    %c0 = arith.constant 0 : index
    %c0_0 = arith.constant 0 : index
    %0 = vector.load %arg0[%c0, %c0_0] : memref<8x32xf32, #tpu.memory_space<vmem>>, vector<8x32xf32>
    %1 = arith.truncf %0 : vector<8x32xf32> to vector<8x32xbf16>
    %c0_1 = arith.constant 0 : index
    %c0_2 = arith.constant 0 : index
    %2 = vector.load %arg1[%c0_1, %c0_2] : memref<32x128xbf16, #tpu.memory_space<vmem>>, vector<32x128xbf16>
    %cst = arith.constant dense<0.000000e+00> : vector<8x128xf32>
    %3 = tpu.matmul %1, %2, %cst {dimension_numbers = #tpu.dot_dimension_numbers<[1], [0], [0], [1], [0, 0, 1, 1], [], []>} : vector<8x32xbf16>, vector<32x128xbf16>, vector<8x128xf32> -> vector<8x128xf32>
    %c0_3 = arith.constant 0 : index
    %c0_4 = arith.constant 0 : index
    %4 = vector.load %arg2[%c0_3, %c0_4] : memref<1x128xf32, #tpu.memory_space<vmem>>, vector<1x128xf32>
    %5 = vector.broadcast %4 : vector<1x128xf32> to vector<8x128xf32>
    %6 = arith.addf %3, %5 : vector<8x128xf32>
    %cst_5 = arith.constant 0.000000e+00 : f32
    %7 = vector.broadcast %cst_5 : f32 to vector<8x128xf32>
    %8 = arith.maximumf %6, %7 : vector<8x128xf32>
    %9 = arith.truncf %8 : vector<8x128xf32> to vector<8x128xbf16>
    %c0_6 = arith.constant 0 : index
    %c0_7 = arith.constant 0 : index
    %10 = vector.load %arg3[%c0_6, %c0_7] : memref<128x128xbf16, #tpu.memory_space<vmem>>, vector<128x128xbf16>
    %cst_8 = arith.constant dense<0.000000e+00> : vector<8x128xf32>
    %11 = tpu.matmul %9, %10, %cst_8 {dimension_numbers = #tpu.dot_dimension_numbers<[1], [0], [0], [1], [0, 0, 1, 1], [], []>} : vector<8x128xbf16>, vector<128x128xbf16>, vector<8x128xf32> -> vector<8x128xf32>
    %c0_9 = arith.constant 0 : index
    %c0_10 = arith.constant 0 : index
    %12 = vector.load %arg4[%c0_9, %c0_10] : memref<1x128xf32, #tpu.memory_space<vmem>>, vector<1x128xf32>
    %13 = vector.broadcast %12 : vector<1x128xf32> to vector<8x128xf32>
    %14 = arith.addf %11, %13 : vector<8x128xf32>
    %c0_11 = arith.constant 0 : index
    %c0_12 = arith.constant 0 : index
    %15 = vector.load %arg5[%c0_11, %c0_12] : memref<8x128xf32, #tpu.memory_space<vmem>>, vector<8x128xf32>
    tpu.vector_store %arg5[%c0_11, %c0_12], %14 {strides = array<i32>} : memref<8x128xf32, #tpu.memory_space<vmem>>, vector<8x128xf32>,
    return
  }
}

</mosaic_0001>

<bundles_post_ra>
// kernel: multimodal_transformer_forward.1
= control target key start
LH: loop header
LB: loop body
LE: loop exit
PB: predicated region body
PF: predicated region fallthrough
CT: control target
= control target key end

     0   :  { %v273_v0 = vmov 0.0   ;;  %vm274_vm0 = vmmov 0   ;;  %vm46_vm1 = vcmask 261120   ;;  %s347_s1 = inlined_call_operand.vmem [shape: bf16[32,128], index: 1, kind: input, shape index: {}]   ;;  %s348_s0 = inlined_call_operand.vmem [shape: f32[8,32], index: 0, kind: input, shape index: {}]   ;;  %s349_s3 = inlined_call_operand.vmem [shape: bf16[128,128], index: 3, kind: input, shape index: {}]   ;;  %s350_s2 = inlined_call_operand.vmem [shape: f32[1,128], index: 2, kind: input, shape index: {}]   ;;  %s351_s4 = inlined_call_operand.vmem [shape: f32[1,128], index: 4, kind: input, shape index: {}]   ;;  %s352_s5 = inlined_call_operand.vmem [shape: f32[8,128], index: 5, kind: output, shape index: {}]  }
   0x1   :  { %233 = vmatprep.subr.bf16.mxu0 %v273_v0  ;;  %v263_v1 = vld [vmem:[%s347_s1] sm:$0xff]   ;;  %237 = vmatprep.mubr.msk.bf16.mxu0 %vm274_vm0, %v273_v0  ;;  %v264_v2 = vld [vmem:[%s347_s1 + $0x8] sm:$0xff]   ;;  %v267_v7 = vld [vmem:[%s349_s3 + $0x10] sm:$0xff]  }
   0x2   :  { %241 = vmatprep.subr.bf16.mxu1 %v273_v0  ;;  %257 = vmatprep.mubr.msk.bf16.mxu1 %vm274_vm0, %v273_v0  ;;  %v21_v3 = vld [vmem:[%s348_s0] sm:$0xff]  ;;  %v266_v6 = vld [vmem:[%s349_s3 + $0x8] sm:$0xff]   ;;  %v268_v8 = vld [vmem:[%s349_s3 + $0x18] sm:$0xff]  }
   0x3   :  { %234 = vmatpush3.bf16.msra.mxu0 %v263_v1  ;;  %v265_v4 = vld [vmem:[%s349_s3] sm:$0xff]   ;;  %v22_v5 = vpack.c.bf16 %v21_v3, %v21_v3  ;;  %v270_v10 = vld [vmem:[%s349_s3 + $0x28] sm:$0xff]   ;;  %v271_v11 = vld [vmem:[%s349_s3 + $0x30] sm:$0xff]  }
   0x4   :  { %235 = vmatprep.subr.bf16.mxu0 %v273_v0  ;;  %242 = vmatpush3.bf16.msra.mxu1 %v265_v4  ;;  %v269_v9 = vld [vmem:[%s349_s3 + $0x20] sm:$0xff]   ;;  %v272_v12 = vld [vmem:[%s349_s3 + $0x38] sm:$0xff]  }
   0x5   :  { %243 = vmatprep.subr.bf16.mxu1 %v273_v0  ;;  %v208_v13 = vld [vmem:[%s350_s2] ss:$0 sm:$0xff] }
   0x6   :  { %v212_v21 = vld [vmem:[%s351_s4] ss:$0 sm:$0xff] }
   0x7   :  { %236 = vmatpush3.bf16.msra.mxu0 %v264_v2 }
   0x8   :  { %244 = vmatpush3.bf16.msra.mxu1 %v266_v6 }
   0x9   :  { %245 = vmatprep.subr.bf16.mxu1 %v273_v0 }
   0xa   :  { %238 = vmatmul.mubr.msk.bf16.vlgmr.msra.gmra.mrb[0].mxu0 %vm46_vm1, %v22_v5 }
   0xc   :  { %246 = vmatpush3.bf16.msra.mxu1 %v267_v7 }
   0xd   :  { %247 = vmatprep.subr.bf16.mxu1 %v273_v0 }
  0x10   :  { %248 = vmatpush3.bf16.msra.mxu1 %v268_v8 }
  0x11   :  { %249 = vmatprep.subr.bf16.mxu1 %v273_v0 }
  0x14   :  { %250 = vmatpush3.bf16.msra.mxu1 %v269_v9 }
  0x15   :  { %251 = vmatprep.subr.bf16.mxu1 %v273_v0 }
  0x18   :  { %252 = vmatpush3.bf16.msra.mxu1 %v270_v10 }
  0x19   :  { %253 = vmatprep.subr.bf16.mxu1 %v273_v0 }
  0x1c   :  { %254 = vmatpush3.bf16.msra.mxu1 %v271_v11 }
  0x1d   :  { %255 = vmatprep.subr.bf16.mxu1 %v273_v0 }
  0x20   :  { %256 = vmatpush3.bf16.msra.mxu1 %v272_v12 }
  0xdd   :  { %v84_v14 = vpop.f32.mrb[0].mxu0 }
  0xde   :  { %v85_v15 = vadd.f32 %v208_v13, %v84_v14  ;;  %v239_v16 = vpop.f32.mrb[1].mxu0 }
  0xdf   :  { %v87_v17 = vpop.f32.mrb[2].mxu0 }
  0xe0   :  { %v90_v18 = vmax.f32 %v85_v15, 0.0  ;;  %v240_v19 = vpop.f32.mrb[3].mxu0 }
  0xe2   :  { %v91_v20 = vpack.c.bf16 %v90_v18, %v90_v18 }
  0xe4   :  { %258 = vmatmul.mubr.bf16.vlgmr.msra.gmra.mrb[0].mxu1 %v91_v20 }
 0x1b7   :  { %v197_v22 = vpop.f32.mrb[0].mxu1 }
 0x1b8   :  { %v198_v23 = vadd.f32 %v212_v21, %v197_v22  ;;  %v259_v24 = vpop.f32.mrb[1].mxu1 }
 0x1b9   :  { %v200_v25 = vpop.f32.mrb[2].mxu1 }
 0x1ba   :  { %203 = vst [vmem:[%s352_s5] sm:$0xff] %v198_v23  ;;  %v260_v26 = vpop.f32.mrb[3].mxu1 }

</bundles_post_ra>
